<compile_context>
chip_gen: v7x
topology: tpu7x:2x2x1
jax: 0.10.0
libtpu: 0.0.40
codegen_flags: <defaults>
</compile_context>

<pallas_src>
import jax
import jax.numpy as jnp
from jax import lax
from jax.experimental import pallas as pl
from jax.experimental.pallas import tpu as pltpu


def _vq_kernel(z_ref, e_ref, et_ref, e2_ref, q_ref, sse_ref):
    """One (1, C, t_hw) tile: nearest-codebook lookup + per-position sq. error.

    z_ref  : (1, D, t_hw)  tile of the input, channels on sublanes, spatial on lanes
    e_ref  : (K, D)        codebook
    et_ref : (D, K)        codebook transposed (precomputed in wrapper)
    e2_ref : (K, 1)        |e_k|^2 (precomputed in wrapper)
    q_ref  : (1, D, t_hw)  quantized tile (out)
    sse_ref: (1, 1, t_hw)  per-spatial-position sum over channels of (q - z)^2 (out)
    """
    z = z_ref[0].astype(jnp.float32)           # (D, t)
    e = e_ref[...].astype(jnp.float32)         # (K, D)
    et = et_ref[...].astype(jnp.float32)       # (D, K)
    e2 = e2_ref[...].astype(jnp.float32)       # (K, 1)

    K = e.shape[0]
    t = z.shape[1]

    # Squared-distance proxy: |e|^2 - 2 e.z   (the per-column |z|^2 term is a
    # constant along K and does not change the argmin).  Kept in f32 to
    # preserve argmin/tie-break parity with the reference.
    dots = jnp.dot(e, z, preferred_element_type=jnp.float32)       # (K, t) MXU, lane-dense
    dist = e2 - 2.0 * dots                                         # (K, t)

    # argmin along the codebook (sublane) axis, first-index tie-breaking
    min_d = jnp.min(dist, axis=0, keepdims=True)                   # (1, t)
    row = lax.broadcasted_iota(jnp.int32, (K, t), 0)                # (K, t)
    idx = jnp.min(jnp.where(dist == min_d, row, K), axis=0, keepdims=True)  # (1, t)

    # one-hot gather: (D, K) @ (K, t) -> (D, t), lane-dense output
    onehot = (row == idx).astype(jnp.float32)                      # (K, t)
    q = jnp.dot(et, onehot, preferred_element_type=jnp.float32)    # (D, t)

    q_ref[0] = q.astype(q_ref.dtype)
    diff = q - z
    sse_ref[0] = jnp.sum(diff * diff, axis=0, keepdims=True)       # (1, t)


def _pick_lane_tile(hw):
    """Largest lane tile (multiple of 128, <= 2048) that divides H*W."""
    for cand in (2048, 1024, 512, 256, 128):
        if hw % cand == 0:
            return cand
    # fall back to the full extent (satisfies the "equal full dim" rule)
    return hw


def vector_quantizer_forward(z, embedding, beta=0.25):
    """Forward pass equivalent to VectorQuantizer.forward.

    z         : (N, C, H, W) float32   (NCHW, like the PyTorch module)
    embedding : (K, D) float32 codebook, D == C
    Returns (quantized in NCHW, scalar loss).
    """
    N, C, H, W = z.shape
    K, D = embedding.shape
    assert D == C, "embedding_dim must equal channel dim of z"

    HW = H * W
    t_hw = _pick_lane_tile(HW)
    n_hw = HW // t_hw

    # Free, contiguous reshape — no transpose, no extra HBM pass.
    z3 = z.reshape(N, C, HW)

    # Tiny codebook-derived constants hoisted out of the kernel.
    e_f32 = embedding.astype(jnp.float32)
    e_t = e_f32.T                                           # (D, K)
    e_sq = jnp.sum(e_f32 * e_f32, axis=1, keepdims=True)    # (K, 1)

    q3, sse = pl.pallas_call(
        _vq_kernel,
        out_shape=(
            jax.ShapeDtypeStruct((N, C, HW), z.dtype),
            jax.ShapeDtypeStruct((N, 1, HW), jnp.float32),
        ),
        grid_spec=pltpu.PrefetchScalarGridSpec(
            num_scalar_prefetch=0,
            grid=(N, n_hw),
            in_specs=[
                pl.BlockSpec((1, C, t_hw), lambda n, i: (n, 0, i)),  # input tile
                pl.BlockSpec((K, D), lambda n, i: (0, 0)),            # codebook
                pl.BlockSpec((D, K), lambda n, i: (0, 0)),            # codebook^T
                pl.BlockSpec((K, 1), lambda n, i: (0, 0)),            # |e|^2
            ],
            out_specs=[
                pl.BlockSpec((1, C, t_hw), lambda n, i: (n, 0, i)),   # quantized
                pl.BlockSpec((1, 1, t_hw), lambda n, i: (n, 0, i)),   # per-pos SSE
            ],
        ),
        compiler_params=pltpu.CompilerParams(
            # Both grid axes are fully independent -> megacore-shardable (v7x).
            dimension_semantics=("parallel", "parallel"),
            # Explicit (conservative) VMEM budget; safe on v5e/v6e/v7x.
            vmem_limit_bytes=32 * 1024 * 1024,
        ),
    )(z3, embedding, e_t, e_sq)

    # mse over all N*C*H*W elements (same reduction as F.mse_loss)
    mse = jnp.sum(sse) / (N * C * H * W)
    # In the forward pass embedding_loss == commitment_loss numerically;
    # the .detach() calls only affect gradients.
    # TODO(synk): add a custom_vjp to reproduce the detach()-split gradients
    # (straight-through + beta-weighted commitment term) for training.
    loss = (1.0 + beta) * mse

    quantized = q3.reshape(N, C, H, W)
    # straight-through estimator: z + (q - z).detach()  (numerically == q)
    quantized = z + lax.stop_gradient(quantized - z)
    return quantized, loss


if __name__ == "__main__":
    num_embeddings = 16   # K
    embedding_dim = 4     # D == channels
    beta = 0.25

    key = jax.random.PRNGKey(0)
    k_z, k_e = jax.random.split(key)

    # deterministic parameter init, matching uniform_(-1/K, 1/K)
    embedding = jax.random.uniform(
        k_e, (num_embeddings, embedding_dim), dtype=jnp.float32,
        minval=-1.0 / num_embeddings, maxval=1.0 / num_embeddings)

    # input z in NCHW: batch=2, channels=4, spatial=16x16
    z = jax.random.normal(k_z, (2, embedding_dim, 16, 16), dtype=jnp.float32)

    quantized, loss = vector_quantizer_forward(z, embedding, beta=beta)
    jax.block_until_ready((quantized, loss))

    assert quantized.shape == z.shape
    assert quantized.dtype == z.dtype
    assert loss.shape == ()
    print("KERNEL_OK")
</pallas_src>

<mosaic_0001>
module attributes {stable_mosaic.version = 11 : i64} {
  func.func @_vq_kernel(%arg0: i32, %arg1: i32, %arg2: memref<1x4x256xf32, #tpu.memory_space<vmem>>, %arg3: memref<16x4xf32, #tpu.memory_space<vmem>>, %arg4: memref<4x16xf32, #tpu.memory_space<vmem>>, %arg5: memref<16x1xf32, #tpu.memory_space<vmem>>, %arg6: memref<1x4x256xf32, #tpu.memory_space<vmem>>, %arg7: memref<1x1x256xf32, #tpu.memory_space<vmem>>) attributes {dimension_semantics = [#tpu.dimension_semantics<parallel>, #tpu.dimension_semantics<parallel>], iteration_bounds = array<i64: 2, 1>, scalar_prefetch = 0 : i64, scratch_operands = 0 : i64, tpu.core_type = #tpu.core_type<tc>, window_params = [{transform_indices = @transform_0, window_bounds = array<i64: 1, 4, 256>}, {pipeline_mode = #tpu.pipeline_mode<synchronous>, transform_indices = @transform_1, window_bounds = array<i64: 16, 4>}, {pipeline_mode = #tpu.pipeline_mode<synchronous>, transform_indices = @transform_2, window_bounds = array<i64: 4, 16>}, {pipeline_mode = #tpu.pipeline_mode<synchronous>, transform_indices = @transform_3, window_bounds = array<i64: 16, 1>}, {transform_indices = @transform_4, window_bounds = array<i64: 1, 4, 256>}, {transform_indices = @transform_5, window_bounds = array<i64: 1, 1, 256>}]} {
    %c0 = arith.constant 0 : index
    %c0_0 = arith.constant 0 : index
    %c0_1 = arith.constant 0 : index
    %0 = vector.load %arg2[%c0, %c0_0, %c0_1] : memref<1x4x256xf32, #tpu.memory_space<vmem>>, vector<1x4x256xf32>
    %1 = vector.shape_cast %0 : vector<1x4x256xf32> to vector<4x256xf32>
    %c0_2 = arith.constant 0 : index
    %c0_3 = arith.constant 0 : index
    %2 = vector.load %arg3[%c0_2, %c0_3] : memref<16x4xf32, #tpu.memory_space<vmem>>, vector<16x4xf32>
    %c0_4 = arith.constant 0 : index
    %c0_5 = arith.constant 0 : index
    %3 = vector.load %arg4[%c0_4, %c0_5] : memref<4x16xf32, #tpu.memory_space<vmem>>, vector<4x16xf32>
    %c0_6 = arith.constant 0 : index
    %c0_7 = arith.constant 0 : index
    %4 = vector.load %arg5[%c0_6, %c0_7] : memref<16x1xf32, #tpu.memory_space<vmem>>, vector<16x1xf32>
    %cst = arith.constant dense<0.000000e+00> : vector<16x256xf32>
    %5 = tpu.matmul %2, %1, %cst {dimension_numbers = #tpu.dot_dimension_numbers<[1], [0], [0], [1], [0, 0, 1, 1], [], []>} : vector<16x4xf32>, vector<4x256xf32>, vector<16x256xf32> -> vector<16x256xf32>
    %cst_8 = arith.constant 2.000000e+00 : f32
    %6 = vector.broadcast %cst_8 : f32 to vector<16x256xf32>
    %7 = arith.mulf %6, %5 : vector<16x256xf32>
    %8 = vector.broadcast %4 : vector<16x1xf32> to vector<16x256xf32>
    %9 = arith.subf %8, %7 : vector<16x256xf32>
    %cst_9 = arith.constant dense<0x7F800000> : vector<256xf32>
    %10 = vector.multi_reduction <minimumf>, %9, %cst_9 [0] : vector<16x256xf32> to vector<256xf32>
    %11 = vector.shape_cast %10 : vector<256xf32> to vector<1x256xf32>
    %12 = tpu.iota {dimensions = array<i32: 0>} : vector<16x256xi32>
    %13 = vector.broadcast %11 : vector<1x256xf32> to vector<16x256xf32>
    %14 = arith.cmpf oeq, %9, %13 : vector<16x256xf32>
    %c16_i32 = arith.constant 16 : i32
    %15 = vector.broadcast %c16_i32 : i32 to vector<16x256xi32>
    %16 = arith.select %14, %12, %15 : vector<16x256xi1>, vector<16x256xi32>
    %cst_10 = arith.constant dense<2147483647> : vector<256xi32>
    %17 = vector.multi_reduction <minsi>, %16, %cst_10 [0] : vector<16x256xi32> to vector<256xi32>
    %18 = vector.shape_cast %17 : vector<256xi32> to vector<1x256xi32>
    %19 = vector.broadcast %18 : vector<1x256xi32> to vector<16x256xi32>
    %20 = arith.cmpi eq, %12, %19 : vector<16x256xi32>
    %21 = arith.extui %20 : vector<16x256xi1> to vector<16x256xi32>
    %22 = arith.sitofp %21 : vector<16x256xi32> to vector<16x256xf32>
    %cst_11 = arith.constant dense<0.000000e+00> : vector<4x256xf32>
    %23 = tpu.matmul %3, %22, %cst_11 {dimension_numbers = #tpu.dot_dimension_numbers<[1], [0], [0], [1], [0, 0, 1, 1], [], []>} : vector<4x16xf32>, vector<16x256xf32>, vector<4x256xf32> -> vector<4x256xf32>
    %c0_12 = arith.constant 0 : index
    %c0_13 = arith.constant 0 : index
    %c0_14 = arith.constant 0 : index
    %24 = vector.load %arg6[%c0_12, %c0_13, %c0_14] : memref<1x4x256xf32, #tpu.memory_space<vmem>>, vector<1x4x256xf32>
    %25 = vector.shape_cast %24 : vector<1x4x256xf32> to vector<4x256xf32>
    %26 = vector.shape_cast %23 : vector<4x256xf32> to vector<1x4x256xf32>
    tpu.vector_store %arg6[%c0_12, %c0_13, %c0_14], %26 {strides = array<i32>} : memref<1x4x256xf32, #tpu.memory_space<vmem>>, vector<1x4x256xf32>,
    %27 = arith.subf %23, %1 : vector<4x256xf32>
    %28 = arith.mulf %27, %27 : vector<4x256xf32>
    %cst_15 = arith.constant dense<0.000000e+00> : vector<256xf32>
    %29 = vector.multi_reduction <add>, %28, %cst_15 [0] : vector<4x256xf32> to vector<256xf32>
    %30 = vector.shape_cast %29 : vector<256xf32> to vector<1x256xf32>
    %c0_16 = arith.constant 0 : index
    %c0_17 = arith.constant 0 : index
    %c0_18 = arith.constant 0 : index
    %31 = vector.load %arg7[%c0_16, %c0_17, %c0_18] : memref<1x1x256xf32, #tpu.memory_space<vmem>>, vector<1x1x256xf32>
    %32 = vector.shape_cast %31 : vector<1x1x256xf32> to vector<1x256xf32>
    %33 = vector.shape_cast %30 : vector<1x256xf32> to vector<1x1x256xf32>
    tpu.vector_store %arg7[%c0_16, %c0_17, %c0_18], %33 {strides = array<i32>} : memref<1x1x256xf32, #tpu.memory_space<vmem>>, vector<1x1x256xf32>,
    return
  }
  func.func @transform_0(%arg0: i32, %arg1: i32) -> (i32, i32, i32) {
    %c0_i32 = arith.constant 0 : i32
    %c0_i32_0 = arith.constant 0 : i32
    return %arg0, %c0_i32, %arg1 : i32, i32, i32
  }
  func.func @transform_1(%arg0: i32, %arg1: i32) -> (i32, i32) {
    %c0_i32 = arith.constant 0 : i32
    %c0_i32_0 = arith.constant 0 : i32
    %c0_i32_1 = arith.constant 0 : i32
    return %c0_i32, %c0_i32_0 : i32, i32
  }
  func.func @transform_2(%arg0: i32, %arg1: i32) -> (i32, i32) {
    %c0_i32 = arith.constant 0 : i32
    %c0_i32_0 = arith.constant 0 : i32
    %c0_i32_1 = arith.constant 0 : i32
    return %c0_i32, %c0_i32_0 : i32, i32
  }
  func.func @transform_3(%arg0: i32, %arg1: i32) -> (i32, i32) {
    %c0_i32 = arith.constant 0 : i32
    %c0_i32_0 = arith.constant 0 : i32
    %c0_i32_1 = arith.constant 0 : i32
    return %c0_i32, %c0_i32_0 : i32, i32
  }
  func.func @transform_4(%arg0: i32, %arg1: i32) -> (i32, i32, i32) {
    %c0_i32 = arith.constant 0 : i32
    %c0_i32_0 = arith.constant 0 : i32
    return %arg0, %c0_i32, %arg1 : i32, i32, i32
  }
  func.func @transform_5(%arg0: i32, %arg1: i32) -> (i32, i32, i32) {
    %c0_i32 = arith.constant 0 : i32
    %c0_i32_0 = arith.constant 0 : i32
    return %arg0, %c0_i32, %arg1 : i32, i32, i32
  }
}

</mosaic_0001>

<bundles_post_ra>
// kernel: tpu_custom_call.1
= control target key start
LH: loop header
LB: loop body
LE: loop exit
PB: predicated region body
PF: predicated region fallthrough
CT: control target
= control target key end

     0   :  { %11 = vsyncpa [#allocation3], 0  ;;  %s1150_s0 = inlined_call_operand.vmem [shape: f32[2,4,256], index: 0, kind: input, shape index: {}]   ;;  %s1151_s1 = inlined_call_operand.vmem [shape: f32[16,4], index: 1, kind: input, shape index: {}]   ;;  %s1152_s2 = inlined_call_operand.vmem [shape: f32[4,16], index: 2, kind: input, shape index: {}]   ;;  %s1153_s3 = inlined_call_operand.vmem [shape: f32[16,1], index: 3, kind: input, shape index: {}]   ;;  %s1154_s4 = inlined_call_operand.hbm [shape: f32[2,4,256], index: 4, kind: output, shape index: {0}]   ;;  %s1155_s5 = inlined_call_operand.hbm [shape: f32[2,1,256], index: 5, kind: output, shape index: {1}]  }
   0x1   :  { %13 = vsyncpa [#allocation3 + $0x1], 0 }
   0x2   :  { %14 = vsyncpa [#allocation5], 0 }
   0x3   :  { %16 = vsyncpa [#allocation5 + $0x1], 0  ;;  %s964_s18 = smov 0   ;;  %s966_s19 = smov 0  }
   0x4   :  { %s968_s20 = smov 0   ;;  %s970_s21 = smov 0  }
   0x5   :  { %s972_s22 = smov 0   ;;  %s974_s23 = smov 0  }
   0x6 LB: > { %s713_s24 = sadd.s32 4294967295, %s926_s23   ;;  %s714_s25 = sadd.s32 4294967294, %s926_s23   ;;  %s926_s23 = sphi %s974_s23, %s22_s23   ;;  %s922_s22 = sphi %s972_s22, %s1162_s22   ;;  %s918_s21 = sphi %s970_s21, %s1161_s21   ;;  %s914_s20 = sphi %s968_s20, %s1160_s20   ;;  %s910_s19 = sphi %s966_s19, %s1159_s19   ;;  %s906_s18 = sphi %s964_s18, %s1158_s18  }
   0x7   : > { %s34_s26 = sadd.s32 1, %s922_s22  ;;  %s134_s27 = sadd.s32 1, %s914_s20 }
   0x8   : > { %p36_p0 = scmp.ge.s32.totalorder %s34_s26, 2  ;;  %p144_p1 = scmp.ne.s32.totalorder %s914_s20, %s910_s19 }
   0x9   : > { %p145_p2 = scmp.eq.s32.totalorder %s713_s24, 1  ;;  %p150_p3 = scmp.ne.s32.totalorder %s910_s19, %s906_s18 }
   0xa   : > { %s1164_s26 = smov (%p36_p0, %s34_s26), 0  ;;  %p151_p5 = scmp.eq.s32.totalorder %s714_s25, 1 }
   0xb   : > { %p1004_p4 = por %p145_p2, %p144_p1  ;;  %s129_s29 = ssub.s32 %s922_s22, %s1164_s26 }
   0xc   : > { %p717_p6 = scmp.ge.s32.totalorder %s926_s23, 1  ;;  %p132_p7 = scmp.eq.s32.totalorder %s129_s29, 0 }
   0xd   : > { %p1011_p8 = por %p151_p5, %p150_p3  ;;  %p219_p9 = scmp.lt.s32.totalorder %s926_s23, 3 }
   0xe   : > { %s1017_s6 = scalar_select %p132_p7, %s914_s20, %s134_s27  }
   0xf   : > { %p220_p10 = pnand %p717_p6, %p219_p9 }
  0x10   : > { %p257_p11 = scmp.lt.s32.totalorder (!%p220_p10), %s918_s21, 1  ;;  %v928_v0 = vmov (!%p220_p10), 0.0   ;;  %v272_v1 = vld [vmem:[%s1153_s3] sm:$0xff] (!%p220_p10)  ;;  %v929_v2 = vmov (!%p220_p10), 0   ;;  %v273_v3 = vld [vmem:[%s1153_s3 + $0x8] sm:$0xff] (!%p220_p10)  ;;  %vm283_vm0 = vcmask (!%p220_p10), 1043456   ;;  %v397_v25 = vlaneseq (!%p220_p10) }
  0x11   : > { %223 = sbr.rel (%p220_p10) target bundleno = 552 (0x228), region = 36  ;;  %352 = vmatprep.mubr.f32.mxu0 (!%p220_p10), %v928_v0  ;;  %510 = vmatprep.mubr.f32.mxu1 (!%p220_p10), %v928_v0  ;;  %v269_v6 = vld [vmem:[%s1151_s1] sm:$0xff] (!%p220_p10)  ;;  %vm276_vm1 = vcmask (!%p220_p10), 31744   ;;  %v270_v7 = vld [vmem:[%s1151_s1 + $0x8] sm:$0xff] (!%p220_p10)  ;;  %v930_v57 = vmov (!%p220_p10), 1.0|1.0  }
  0x12   : > { %814 = vset.pattern.permute.xlu0 (!%p220_p10), %v929_v2  ;;  %v1047_v30 = vshrl.u32 (!%p220_p10), %v397_v25, 7  ;;  %v271_v58 = vld [vmem:[%s1152_s2] sm:$0xf] (!%p220_p10)  ;;  %s1058_s7 = sand.u32 (!%p220_p10), 1, %s910_s19   ;;  %s931_s17 = smov (!%p220_p10), [#allocation2]  }
  0x13   : > { %371 = vperm.xlu0 (!%p220_p10), %814, %v272_v1   ;;  %s718_s8 = sshll.u32 (!%p220_p10), %s1058_s7, 3  ;;  %s820_s24 = sshll.u32 (!%p220_p10), %s931_s17, 4  ;;  %s821_s24 = int_to_ptr.vmem [resolvable:$false] %s820_s24 }
  0x14   : > { %v399_v35 = vadd.s32 (!%p220_p10), 8, %v1047_v30  ;;  %s822_s25 = scalar_lea.vmem (!%p220_p10), %s821_s24, 256 }
  0x17   : > { %376 = vperm.xlu0 (!%p220_p10), %814, %v273_v3  }
  0x18   : > { %s258_s9 = scalar_select %p257_p11, %s918_s21, 1 }
  0x1a   : > { %s743_s10 = sshll.u32 %s258_s9, 3  ;;  %s744_s9 = sshll.u32 %s918_s21, 7 }
  0x1b   : > { %s264_s15 = scalar_lea.vmem %s1150_s0, %s743_s10  ;;  %s248_s10 = scalar_lea.vmem [#allocation2], %s718_s8 }
  0x1c   : > { %v1030_v4 = vld [vmem:[%s264_s15] sm:$0xff]  ;;  %s586_s11 = sshll.u32 %s248_s10, 4  ;;  %s1067_s14 = scalar_lea.hbm %s1154_s4, %s744_s9  ;;  %s1069_s11 = int_to_ptr.vmem [resolvable:$true] %s586_s11 }
  0x1d   : > { %v1034_v5 = vcombine.high %v1030_v4, %v1030_v4  ;;  %s565_s15 = scalar_lea.sflag [#allocation3], %s1058_s7  ;;  %s816_s16 = scalar_lea.vmem %s1069_s11, 128 }
  0x1e   : > { %p817_p12 = scmp.ne.s32.totalorder %s1069_s11, %s816_s16  ;;  %p823_p1 = scmp.lt.s32.totalorder %s1069_s11, %s821_s24 }
  0x1f   : > { %722 = vmatprep.subr.msk.mxu0 %vm283_vm0, %v1034_v5  ;;  %p824_p2 = scmp.lt.s32.totalorder %s822_s25, %s816_s16 }
  0x20   : > { %723 = vmatpush1.msk.msra.mxu0 %vm283_vm0, %v1030_v4  ;;  %p818_p13 = pnand %p817_p12, %p1004_p4 }
  0x21   : > { %724 = vmatmul.mubr.msk.f32.vlgmr.msra.gmra.mrb[0].mxu0 %vm276_vm1, %v269_v6  ;;  %p825_p3 = por %p824_p2, %p823_p1 }
  0x22   : > { %358 = vmatprep.mubr.f32.mxu0 %v928_v0  ;;  %p819_p0 = pneg %p818_p13 }
  0x24   : > { %p826_p5 = pnand %p825_p3, %p819_p0 }
  0x25   : > { %725 = vmatmul.mubr.msk.f32.gmra.mrb[2].mxu0 %vm276_vm1, %v270_v7 }
  0x92   : > { %v372_v8 = vpop.permute.xlu0 %371 }
  0x96   : > { %v377_v16 = vpop.permute.xlu0 %376 }
  0xf4   : > { %v354_v9 = vpop.f32.mrb[0].mxu0 }
  0xf5   : > { %v356_v10 = vpop.f32.mrb[1].mxu0  ;;  %v365_v11 = vmul.f32 2.0, %v354_v9 }
  0xf6   : > { %v366_v12 = vmul.f32 2.0, %v356_v10 }
  0xf7   : > { %v379_v18 = vsub.f32 %v372_v8, %v365_v11 }
  0xf8   : > { %v360_v13 = vpop.f32.mrb[2].mxu0  ;;  %v380_v20 = vsub.f32 %v372_v8, %v366_v12 }
  0xf9   : > { %v367_v14 = vmul.f32 2.0, %v360_v13  ;;  %v362_v15 = vpop.f32.mrb[3].mxu0 }
  0xfa   : > { %v368_v17 = vmul.f32 2.0, %v362_v15 }
  0xfb   : > { %v381_v19 = vsub.f32 %v377_v16, %v367_v14 }
  0xfc   : > { %v382_v21 = vsub.f32 %v377_v16, %v368_v17 }
  0xfd   : > { %v383_v22 = vmin.f32 %v379_v18, %v381_v19 }
  0xfe   : > { %v390_v23 = vmin.f32 %v380_v20, %v382_v21 }
  0xff   : > { %v384_v24 = vrot.slane %v383_v22, 4 }
 0x100   : > { %v391_v26 = vrot.slane %v390_v23, 4 }
 0x101   : > { %v385_v27 = vmin.f32 %v383_v22, %v384_v24 }
 0x102   : > { %v392_v28 = vmin.f32 %v390_v23, %v391_v26 }
 0x103   : > { %v386_v29 = vrot.slane %v385_v27, 2 }
 0x104   : > { %v393_v31 = vrot.slane %v392_v28, 2 }
 0x105   : > { %v387_v32 = vmin.f32 %v385_v27, %v386_v29 }
 0x106   : > { %v394_v33 = vmin.f32 %v392_v28, %v393_v31 }
 0x107   : > { %v388_v34 = vrot.slane %v387_v32, 1 }
 0x108   : > { %v395_v36 = vrot.slane %v394_v33, 1 }
 0x109   : > { %v389_v37 = vmin.f32 %v387_v32, %v388_v34 }
 0x10a   : > { %v396_v38 = vmin.f32 %v394_v33, %v395_v36 }
 0x10b   : > { %vm400_vm2 = vcmp.eq.f32.partialorder %v379_v18, %v389_v37  ;;  %vm402_vm3 = vcmp.eq.f32.partialorder %v381_v19, %v389_v37 }
 0x10c   : > { %v404_v39 = vsel %vm400_vm2, %v1047_v30, 16  ;;  %v406_v40 = vsel %vm402_vm3, %v399_v35, 16  ;;  %vm401_vm4 = vcmp.eq.f32.partialorder %v380_v20, %v396_v38  ;;  %vm403_vm5 = vcmp.eq.f32.partialorder %v382_v21, %v396_v38 }
 0x10d   : > { %vm408_vm6 = vcmp.lt.s32.totalorder %v404_v39, %v406_v40  ;;  %v405_v41 = vsel %vm401_vm4, %v1047_v30, 16  ;;  %v407_v42 = vsel %vm403_vm5, %v399_v35, 16  ;;  %vm442_vm5 = vcmask 130048  }
 0x10e   : > { %v409_v43 = vsel %vm408_vm6, %v404_v39, %v406_v40  ;;  %vm419_vm7 = vcmp.lt.s32.totalorder %v405_v41, %v407_v42 }
 0x10f   : > { %v410_v44 = vrot.slane %v409_v43, 4  ;;  %v420_v45 = vsel %vm419_vm7, %v405_v41, %v407_v42 }
 0x110   : > { %v421_v46 = vrot.slane %v420_v45, 4 }
 0x111   : > { %vm411_vm8 = vcmp.lt.s32.totalorder %v409_v43, %v410_v44 }
 0x112   : > { %vm422_vm9 = vcmp.lt.s32.totalorder %v420_v45, %v421_v46  ;;  %v412_v47 = vsel %vm411_vm8, %v409_v43, %v410_v44 }
 0x113   : > { %v423_v48 = vsel %vm422_vm9, %v420_v45, %v421_v46  ;;  %v413_v49 = vrot.slane %v412_v47, 2 }
 0x114   : > { %v424_v50 = vrot.slane %v423_v48, 2 }
 0x115   : > { %vm414_vm10 = vcmp.lt.s32.totalorder %v412_v47, %v413_v49 }
 0x116   : > { %vm425_vm11 = vcmp.lt.s32.totalorder %v423_v48, %v424_v50  ;;  %v415_v51 = vsel %vm414_vm10, %v412_v47, %v413_v49 }
 0x117   : > { %v426_v52 = vsel %vm425_vm11, %v423_v48, %v424_v50  ;;  %v416_v53 = vrot.slane %v415_v51, 1 }
 0x118   : > { %v427_v54 = vrot.slane %v426_v52, 1 }
 0x119   : > { %vm417_vm12 = vcmp.lt.s32.totalorder %v415_v51, %v416_v53 }
 0x11a   : > { %vm428_vm13 = vcmp.lt.s32.totalorder %v426_v52, %v427_v54  ;;  %v418_v55 = vsel %vm417_vm12, %v415_v51, %v416_v53 }
 0x11b   : > { %v429_v56 = vsel %vm428_vm13, %v426_v52, %v427_v54  ;;  %vm430_vm14 = vcmp.eq.s32.totalorder %v1047_v30, %v418_v55  ;;  %vm432_vm15 = vcmp.eq.s32.totalorder %v399_v35, %v418_v55 }
 0x11c   : > { %vm431_vm1 = vcmp.eq.s32.totalorder %v1047_v30, %v429_v56  ;;  %vm433_vm2 = vcmp.eq.s32.totalorder %v399_v35, %v429_v56  ;;  %vm748_vm4 = vmpackc.low %vm432_vm15, %vm430_vm14 }
 0x11d   : > { %vm746_vm3 = vmpackc.low %vm433_vm2, %vm431_vm1 }
 0x11e   : > { %747 = vmatprep.subr.msk.bf16.mxu1 %vm746_vm3, %v930_v57 }
 0x11f   : > { %749 = vmatpush1.bf16.msk.msra.mxu1 %vm748_vm4, %v930_v57 }
 0x122   : > { %734 = vmatmul.mubr.msk.f32.vlgmr.msra.gmra.mrb[0].mxu1 %vm442_vm5, %v271_v58 }
 0x1f5   : > { %v512_v59 = vpop.f32.mrb[0].mxu1 }
 0x1f6   : > { %v523_v60 = vsub.f32 %v512_v59, %v1030_v4  ;;  %v514_v61 = vpop.f32.mrb[1].mxu1 }
 0x1f7   : > { %v519_v62 = vcombine.low %v512_v59, %v514_v61  ;;  %v524_v63 = vsub.f32 %v514_v61, %v1034_v5 }
 0x1f8   : > { %v525_v0 = vmul.f32 %v523_v60, %v523_v60 }
 0x1f9   : > { %521 = vst [vmem:[%s248_s10] sm:$0xff] %v519_v62  ;;  %v526_v1 = vmul.f32 %v524_v63, %v524_v63 }
 0x1fa   : > { %v527_v2 = vsel %vm283_vm0, %v525_v0, 0.0 }
 0x1fb   : > { %829 = shalt.err (!%p826_p5)
}
 0x1fc   : > { %s830_s27 = scalar_lea.hbm %s1067_s14, 128  ;;  %s834_s9 = scalar_lea.hbm %s1154_s4, 256 }
 0x1fd   : > { %p831_p6 = scmp.ne.s32.totalorder %s1067_s14, %s830_s27  ;;  %p835_p10 = scmp.lt.u32.totalorder %s1067_s14, %s1154_s4 }
 0x1fe   : > { %p836_p11 = scmp.lt.u32.totalorder %s834_s9, %s830_s27  ;;  %p838_p13 = scmp.lt.u32.totalorder %s830_s27, %s1067_s14 }
 0x1ff   : > { %p832_p7 = pnand %p831_p6, %p1004_p4 }
 0x200   : > { %p837_p12 = por %p836_p11, %p835_p10 }
 0x201   : > { %p833_p9 = pneg %p832_p7 }
 0x202   : > { %p839_p0 = por %p838_p13, %p837_p12 }
 0x204   : > { %p840_p1 = pnand %p839_p0, %p833_p9 }
 0x206   : > { %843 = shalt.err (!%p840_p1)
}
 0x207   : > { %750 = dma.vmem_to_hbm [thread:$0]  (%p1004_p4), %s1069_s11, 128, %s1067_s14, %s565_s15   ;;  %v528_v3 = vrot.slane %v527_v2, 4  ;;  %v534_v4 = vsel %vm283_vm0, %v526_v1, 0.0  ;;  %v932_v8 = vmov 1966171168   ;;  %vm561_vm0 = vcmp.lt.s32.totalorder %v397_v25, 256 }
 0x208   : > { %v535_v5 = vrot.slane %v534_v4, 4  ;;  %v545_v9 = vunpack.c.l.s4 %v932_v8  ;;  %s719_s13 = sshll.u32 %s1058_s7, 1  ;;  %s745_s11 = sshll.u32 %s918_s21, 5 }
 0x209   : > { %v529_v6 = vadd.f32 %v528_v3, %v527_v2  ;;  %s255_s14 = scalar_lea.vmem [#allocation4], %s719_s13  ;;  %s1102_s24 = scalar_lea.hbm %s1155_s5, %s745_s11 }
 0x20a   : > { %v536_v7 = vadd.f32 %v535_v5, %v534_v4  ;;  %v546_v14 = vunpack.c.0.s8 %v545_v9  ;;  %s602_s15 = sshll.u32 %s255_s14, 4  ;;  %s570_s25 = scalar_lea.sflag [#allocation5], %s1058_s7  ;;  %s1104_s15 = int_to_ptr.vmem [resolvable:$true] %s602_s15 }
 0x20b   : > { %v530_v10 = vrot.slane %v529_v6, 2  ;;  %s844_s27 = scalar_lea.vmem %s1104_s15, 32  ;;  %s933_s21 = smov [#allocation4]  }
 0x20c   : > { %v537_v11 = vrot.slane %v536_v7, 2  ;;  %v549_v19 = vsub.s32 %v546_v14, %v1047_v30  ;;  %p845_p2 = scmp.ne.s32.totalorder %s1104_s15, %s844_s27  ;;  %s848_s29 = sshll.u32 %s933_s21, 4  ;;  %s849_s29 = int_to_ptr.vmem [resolvable:$false] %s848_s29 }
 0x20d   : > { %v531_v12 = vadd.f32 %v530_v10, %v529_v6  ;;  %s850_s8 = scalar_lea.vmem %s849_s29, 64  ;;  %p851_p6 = scmp.lt.s32.totalorder %s1104_s15, %s849_s29 }
 0x20e   : > { %v538_v13 = vadd.f32 %v537_v11, %v536_v7  ;;  %p846_p3 = pnand %p845_p2, %p1004_p4  ;;  %p852_p7 = scmp.lt.s32.totalorder %s850_s8, %s844_s27 }
 0x20f   : > { %v532_v15 = vrot.slane %v531_v12, 1 }
 0x210   : > { %v539_v16 = vrot.slane %v538_v13, 1  ;;  %p847_p5 = pneg %p846_p3  ;;  %p853_p9 = por %p852_p7, %p851_p6 }
 0x211   : > { %v533_v17 = vadd.f32 %v532_v15, %v531_v12 }
 0x212   : > { %v540_v18 = vadd.f32 %v539_v16, %v538_v13  ;;  %p854_p10 = pnand %p853_p9, %p847_p5 }
 0x214   : > { %v543_v20 = vcombine.low %v533_v17, %v540_v18 }
 0x216   : > { %v550_v21 = vrot.slane %v543_v20, %v549_v19 }
 0x218   : > { %v557_v22 = vrot.slane %v550_v21, %v549_v19 }
 0x21a   : > { %563 = vst.msk [vmem:[%s255_s14] sm:$0x3] %vm561_vm0, %v557_v22 }
 0x21b   : > { %857 = shalt.err (!%p854_p10)
}
 0x21c   : > { %s858_s7 = scalar_lea.hbm %s1102_s24, 32  ;;  %s862_s12 = scalar_lea.hbm %s1155_s5, 64 }
 0x21d   : > { %p859_p11 = scmp.ne.s32.totalorder %s1102_s24, %s858_s7  ;;  %p863_p0 = scmp.lt.u32.totalorder %s1102_s24, %s1155_s5 }
 0x21e   : > { %p864_p1 = scmp.lt.u32.totalorder %s862_s12, %s858_s7  ;;  %p866_p3 = scmp.lt.u32.totalorder %s858_s7, %s1102_s24 }
 0x21f   : > { %p860_p12 = pnand %p859_p11, %p1004_p4 }
 0x220   : > { %p865_p2 = por %p864_p1, %p863_p0 }
 0x221   : > { %p861_p13 = pneg %p860_p12 }
 0x222   : > { %p867_p5 = por %p866_p3, %p865_p2 }
 0x224   : > { %p868_p6 = pnand %p867_p5, %p861_p13 }
 0x226   : > { %871 = shalt.err (!%p868_p6)
}
 0x227   : > { %751 = dma.vmem_to_hbm [thread:$0]  (%p1004_p4), %s1104_s15, 32, %s1102_s24, %s570_s25  }
 0x228 PF: > { %p761_p7 = scmp.ge.s32.totalorder %s926_s23, 2  ;;  %s614_s14 = sand.u32 1, %s906_s18  }
 0x229   : > { %s615_s16 = scalar_lea.sflag [#allocation3], %s614_s14 }
 0x22a   : > { %p755_p9 = pnand %p761_p7, %p1011_p8 }
 0x22c   : > { %897 = dma.done.wait (!%p755_p9), %s615_s16, 128  }
 0x22d   : > { %899 = vsyncadd (!%p755_p9), %s615_s16, 4294967168  ;;  %s624_s17 = scalar_lea.sflag [#allocation5], %s614_s14 }
 0x22e   : > { %901 = dma.done.wait (!%p755_p9), %s624_s17, 32  }
 0x22f   : > { %903 = vsyncadd (!%p755_p9), %s624_s17, 4294967264  ;;  %s22_s23 = sadd.s32 1, %s926_s23   ;;  %s1158_s18 = smov %s910_s19 }
 0x230   : > { %p19_p10 = scmp.ge.s32.totalorder %s22_s23, 4   ;;  %s1159_s19 = smov %s914_s20 }
 0x231   : > { %s1160_s20 = smov %s1017_s6  ;;  %s1161_s21 = smov %s922_s22 }
 0x232   : > { %s1162_s22 = smov %s1164_s26  ;;  %21 = sbr.rel (!%p19_p10) target bundleno = 6 (0x6), region = 88 }
 0x239   :  { %629 = vsyncpa [#allocation3], 1 }
 0x23a   :  { %631 = vsyncpa [#allocation3 + $0x1], 1 }
 0x23b   :  { %632 = vsyncpa [#allocation5], 1 }
 0x23c   :  { %634 = vsyncpa [#allocation5 + $0x1], 1 }

</bundles_post_ra>
